<compile_context>
chip_gen: v7x
topology: tpu7x:2x2x1
jax: 0.10.0
libtpu: 0.0.40
codegen_flags: <defaults>
</compile_context>

<pallas_src>
import jax
import jax.numpy as jnp
from jax.experimental import pallas as pl
from jax.experimental.pallas import tpu as pltpu

_BN_EPS = 1e-5
_LEAKY_SLOPE = 0.1
_MM_DTYPE = jnp.bfloat16          # MXU-input / conv-intermediate dtype


def _round_up(x, m):
    return (x + m - 1) // m * m


def _vmem_capacity_bytes():
    try:
        return int(pltpu.get_tpu_info().vmem_capacity_bytes)
    except Exception:
        return 64 * 1024 * 1024   # conservative fallback (v7x per-TC VMEM)


def _pick_tile_m(M, K, Cout_p):
    """Largest lane-tile (multiple of 128) whose double-buffered footprint
    fits ~70% of this chip's VMEM (v5e/v6e: 128 MiB, v7x: 64 MiB)."""
    mm_bytes = jnp.dtype(_MM_DTYPE).itemsize
    budget = int(_vmem_capacity_bytes() * 0.7)
    fixed = 2 * Cout_p * K * mm_bytes                       # resident weight (2 bufs)
    per_col = 2 * K * mm_bytes + 2 * Cout_p * mm_bytes      # patch + conv-out tiles
    tm_cap = max((budget - fixed) // per_col, 128)
    tm = min(2048, tm_cap, _round_up(M, 128))
    return max(128, (tm // 128) * 128)


def _conv_stats_kernel(w_ref, p_ref, conv_ref, sum_ref, sumsq_ref):
    """Conv-as-matmul on one M-tile + streaming per-channel BN statistics.

    w_ref:     (Cout_p, K)   bf16  transposed conv weight (resident)
    p_ref:     (K, TM)       bf16  transposed im2col patch tile (lane-dense)
    conv_ref:  (Cout_p, TM)  bf16  conv output tile (lane-dense)
    sum_ref:   (Cout_p, 1)   f32   per-core sum_m y    (resident accumulator)
    sumsq_ref: (Cout_p, 1)   f32   per-core sum_m y^2  (resident accumulator)
    """
    @pl.when(pl.program_id(1) == 0)
    def _():
        sum_ref[...] = jnp.zeros_like(sum_ref)
        sumsq_ref[...] = jnp.zeros_like(sumsq_ref)

    y = jnp.dot(w_ref[...], p_ref[...], preferred_element_type=jnp.float32)
    conv_ref[...] = y.astype(conv_ref.dtype)
    # Lane-axis reductions run on the XLU slot (free filler under MXU/DMA).
    sum_ref[...] += jnp.sum(y, axis=-1, keepdims=True)
    sumsq_ref[...] += jnp.sum(y * y, axis=-1, keepdims=True)


@jax.jit
def downsampling_layer(x_nchw, conv_weight, bn_gamma, bn_beta):
    """Forward pass of DownSamplingLayer.

    x_nchw:      (N, Cin, H, W)      float32
    conv_weight: (Cout, Cin, 3, 3)   float32
    bn_gamma:    (Cout,)             float32
    bn_beta:     (Cout,)             float32
    returns:     (N, Cout, Ho, Wo)   float32,  Ho = (H+2-3)//2 + 1
    """
    N, Cin, H, W = x_nchw.shape
    Cout = conv_weight.shape[0]
    Ho = (H + 2 - 3) // 2 + 1
    Wo = (W + 2 - 3) // 2 + 1
    M = N * Ho * Wo
    K = 9 * Cin

    Cout_p = _round_up(Cout, 16)                 # bf16 packs 16 sublanes / vreg
    TM = _pick_tile_m(M, K, Cout_p)
    Mp = _round_up(M, 2 * TM)                    # even tile count for 2-core split
    n_inner = (Mp // TM) // 2
    vmem_limit = int(_vmem_capacity_bytes() * 0.8)

    # --- glue (bf16): pad + transposed im2col (K, Mp), lane-dense along M ---
    # TODO(synk): fuse this gather into the kernel with manual halo DMA.
    xp = jnp.pad(x_nchw.astype(_MM_DTYPE), ((0, 0), (0, 0), (1, 1), (1, 1)))
    taps = [xp[:, :, kh:kh + 2 * Ho:2, kw:kw + 2 * Wo:2]        # (N,Cin,Ho,Wo)
            for kh in range(3) for kw in range(3)]
    patches_t = jnp.stack(taps, axis=0)                          # (9,N,Cin,Ho,Wo)
    patches_t = jnp.transpose(patches_t, (0, 2, 1, 3, 4)).reshape(K, M)
    patches_t = jnp.pad(patches_t, ((0, 0), (0, Mp - M)))        # zero cols: stats exact

    # Weight (Cout,Cin,3,3) -> (Cout,kh,kw,Cin) -> (Cout,K); tap-major K
    # ordering matches patches_t.  Pad Cout rows with zeros.
    w_t = jnp.transpose(conv_weight, (0, 2, 3, 1)).reshape(Cout, K)
    w_t = jnp.pad(w_t, ((0, Cout_p - Cout), (0, 0))).astype(_MM_DTYPE)

    # --- pass 1: conv matmul tiles + streaming per-channel sum / sum-sq ---
    conv_y, ch_sum, ch_sumsq = pl.pallas_call(
        _conv_stats_kernel,
        out_shape=(
            jax.ShapeDtypeStruct((Cout_p, Mp), _MM_DTYPE),       # conv (bf16)
            jax.ShapeDtypeStruct((2, Cout_p, 1), jnp.float32),   # per-core sum
            jax.ShapeDtypeStruct((2, Cout_p, 1), jnp.float32),   # per-core sumsq
        ),
        grid=(2, n_inner),
        in_specs=[
            pl.BlockSpec((Cout_p, K), lambda c, i: (0, 0)),              # weight, resident
            pl.BlockSpec((K, TM), lambda c, i: (0, c * n_inner + i)),    # patch tile
        ],
        out_specs=(
            pl.BlockSpec((Cout_p, TM), lambda c, i: (0, c * n_inner + i)),
            pl.BlockSpec((None, Cout_p, 1), lambda c, i: (c, 0, 0)),     # sum slot
            pl.BlockSpec((None, Cout_p, 1), lambda c, i: (c, 0, 0)),     # sumsq slot
        ),
        compiler_params=pltpu.CompilerParams(
            dimension_semantics=("parallel", "arbitrary"),
            vmem_limit_bytes=vmem_limit,
        ),
    )(w_t, patches_t)

    # --- fold batch statistics into per-channel scale / shift (tiny) ---
    inv_m = 1.0 / float(M)
    s1 = jnp.sum(ch_sum, axis=0)[:Cout, 0]
    s2 = jnp.sum(ch_sumsq, axis=0)[:Cout, 0]
    mean = s1 * inv_m
    var = jnp.maximum(s2 * inv_m - mean * mean, 0.0)       # biased (batch) variance
    inv_std = jax.lax.rsqrt(var + _BN_EPS)
    scale = (bn_gamma * inv_std).reshape(Cout, 1)
    shift = (bn_beta - mean * bn_gamma * inv_std).reshape(Cout, 1)

    # --- epilogue: affine + LeakyReLU, fused by XLA into the NCHW transform ---
    y = conv_y[:Cout, :M].astype(jnp.float32) * scale + shift
    y = jnp.maximum(y, _LEAKY_SLOPE * y)
    out = jnp.transpose(y.reshape(Cout, N, Ho, Wo), (1, 0, 2, 3))
    return out


def _reference(x, w, gamma, beta):
    """Pure-f32 reference: conv(3x3, s2, p1) -> BN (batch stats) -> LeakyReLU."""
    y = jax.lax.conv_general_dilated(
        x, w, window_strides=(2, 2), padding=((1, 1), (1, 1)),
        dimension_numbers=("NCHW", "OIHW", "NCHW"))
    mean = jnp.mean(y, axis=(0, 2, 3), keepdims=True)
    var = jnp.mean((y - mean) ** 2, axis=(0, 2, 3), keepdims=True)
    yn = (y - mean) * jax.lax.rsqrt(var + _BN_EPS)
    yn = yn * gamma.reshape(1, -1, 1, 1) + beta.reshape(1, -1, 1, 1)
    return jnp.where(yn >= 0, yn, _LEAKY_SLOPE * yn)


if __name__ == "__main__":
    # Small shapes consistent with the module: N=2, in_channels=4,
    # out_channels=8, spatial 16x16 -> output 8x8.
    N, Cin, Cout, H, W = 2, 4, 8, 16, 16

    key = jax.random.PRNGKey(0)
    kx, kw = jax.random.split(key)

    x = jax.random.normal(kx, (N, Cin, H, W), dtype=jnp.float32)
    conv_weight = 0.1 * jax.random.normal(kw, (Cout, Cin, 3, 3), dtype=jnp.float32)
    bn_gamma = jnp.linspace(0.5, 1.5, Cout, dtype=jnp.float32)
    bn_beta = jnp.linspace(-0.2, 0.2, Cout, dtype=jnp.float32)

    out = downsampling_layer(x, conv_weight, bn_gamma, bn_beta)
    out = jax.block_until_ready(out)

    assert out.shape == (N, Cout, H // 2, W // 2), out.shape
    assert out.dtype == jnp.float32

    # Check against the true f32 module semantics; tolerances account for the
    # bf16 MXU inputs and bf16 conv intermediate (f32 accumulation / stats).
    ref = _reference(x, conv_weight, bn_gamma, bn_beta)
    max_diff = float(jnp.max(jnp.abs(out - ref)))
    mean_diff = float(jnp.mean(jnp.abs(out - ref)))
    assert max_diff < 5e-2, f"max diff vs reference: {max_diff}"
    assert mean_diff < 5e-3, f"mean diff vs reference: {mean_diff}"

    print("KERNEL_OK")
</pallas_src>

<mosaic_0001>
module attributes {stable_mosaic.version = 11 : i64} {
  func.func @_conv_stats_kernel(%arg0: i32, %arg1: i32, %arg2: memref<16x36xbf16, #tpu.memory_space<vmem>>, %arg3: memref<36x128xbf16, #tpu.memory_space<vmem>>, %arg4: memref<16x128xbf16, #tpu.memory_space<vmem>>, %arg5: memref<1x16x1xf32, #tpu.memory_space<vmem>>, %arg6: memref<1x16x1xf32, #tpu.memory_space<vmem>>) attributes {dimension_semantics = [#tpu.dimension_semantics<parallel>, #tpu.dimension_semantics<arbitrary>], iteration_bounds = array<i64: 2, 1>, scalar_prefetch = 0 : i64, scratch_operands = 0 : i64, tpu.core_type = #tpu.core_type<tc>, window_params = [{pipeline_mode = #tpu.pipeline_mode<synchronous>, transform_indices = @transform_0, window_bounds = array<i64: 16, 36>}, {transform_indices = @transform_1, window_bounds = array<i64: 36, 128>}, {transform_indices = @transform_2, window_bounds = array<i64: 16, 128>}, {transform_indices = @transform_3, window_bounds = array<i64: 1, 16, 1>}, {transform_indices = @transform_4, window_bounds = array<i64: 1, 16, 1>}]} {
    %c0_i32 = arith.constant 0 : i32
    %0 = arith.cmpi eq, %arg1, %c0_i32 : i32
    %1 = arith.extui %0 : i1 to i32
    %c0_i32_0 = arith.constant 0 : i32
    %2 = arith.cmpi ne, %1, %c0_i32_0 : i32
    scf.if %2 {
      %cst_20 = arith.constant 0.000000e+00 : f32
      %25 = vector.broadcast %cst_20 : f32 to vector<16x1xf32>
      %c0_21 = arith.constant 0 : index
      %c0_22 = arith.constant 0 : index
      %c0_23 = arith.constant 0 : index
      %26 = vector.load %arg5[%c0_21, %c0_22, %c0_23] : memref<1x16x1xf32, #tpu.memory_space<vmem>>, vector<1x16x1xf32>
      %27 = vector.shape_cast %26 : vector<1x16x1xf32> to vector<16x1xf32>
      %28 = vector.shape_cast %25 : vector<16x1xf32> to vector<1x16x1xf32>
      tpu.vector_store %arg5[%c0_21, %c0_22, %c0_23], %28 {strides = array<i32>} : memref<1x16x1xf32, #tpu.memory_space<vmem>>, vector<1x16x1xf32>,
      %cst_24 = arith.constant 0.000000e+00 : f32
      %29 = vector.broadcast %cst_24 : f32 to vector<16x1xf32>
      %c0_25 = arith.constant 0 : index
      %c0_26 = arith.constant 0 : index
      %c0_27 = arith.constant 0 : index
      %30 = vector.load %arg6[%c0_25, %c0_26, %c0_27] : memref<1x16x1xf32, #tpu.memory_space<vmem>>, vector<1x16x1xf32>
      %31 = vector.shape_cast %30 : vector<1x16x1xf32> to vector<16x1xf32>
      %32 = vector.shape_cast %29 : vector<16x1xf32> to vector<1x16x1xf32>
      tpu.vector_store %arg6[%c0_25, %c0_26, %c0_27], %32 {strides = array<i32>} : memref<1x16x1xf32, #tpu.memory_space<vmem>>, vector<1x16x1xf32>,
    } else {
    }
    %c0 = arith.constant 0 : index
    %c0_1 = arith.constant 0 : index
    %3 = vector.load %arg2[%c0, %c0_1] : memref<16x36xbf16, #tpu.memory_space<vmem>>, vector<16x36xbf16>
    %c0_2 = arith.constant 0 : index
    %c0_3 = arith.constant 0 : index
    %4 = vector.load %arg3[%c0_2, %c0_3] : memref<36x128xbf16, #tpu.memory_space<vmem>>, vector<36x128xbf16>
    %cst = arith.constant dense<0.000000e+00> : vector<16x128xf32>
    %5 = tpu.matmul %3, %4, %cst {dimension_numbers = #tpu.dot_dimension_numbers<[1], [0], [0], [1], [0, 0, 1, 1], [], []>} : vector<16x36xbf16>, vector<36x128xbf16>, vector<16x128xf32> -> vector<16x128xf32>
    %6 = arith.truncf %5 : vector<16x128xf32> to vector<16x128xbf16>
    %c0_4 = arith.constant 0 : index
    %c0_5 = arith.constant 0 : index
    %7 = vector.load %arg4[%c0_4, %c0_5] : memref<16x128xbf16, #tpu.memory_space<vmem>>, vector<16x128xbf16>
    tpu.vector_store %arg4[%c0_4, %c0_5], %6 {strides = array<i32>} : memref<16x128xbf16, #tpu.memory_space<vmem>>, vector<16x128xbf16>,
    %c0_6 = arith.constant 0 : index
    %c0_7 = arith.constant 0 : index
    %c0_8 = arith.constant 0 : index
    %8 = vector.load %arg5[%c0_6, %c0_7, %c0_8] : memref<1x16x1xf32, #tpu.memory_space<vmem>>, vector<1x16x1xf32>
    %9 = vector.shape_cast %8 : vector<1x16x1xf32> to vector<16x1xf32>
    %cst_9 = arith.constant dense<0.000000e+00> : vector<16xf32>
    %10 = vector.multi_reduction <add>, %5, %cst_9 [1] : vector<16x128xf32> to vector<16xf32>
    %11 = vector.shape_cast %10 : vector<16xf32> to vector<16x1xf32>
    %12 = arith.addf %9, %11 : vector<16x1xf32>
    %c0_10 = arith.constant 0 : index
    %c0_11 = arith.constant 0 : index
    %c0_12 = arith.constant 0 : index
    %13 = vector.load %arg5[%c0_10, %c0_11, %c0_12] : memref<1x16x1xf32, #tpu.memory_space<vmem>>, vector<1x16x1xf32>
    %14 = vector.shape_cast %13 : vector<1x16x1xf32> to vector<16x1xf32>
    %15 = vector.shape_cast %12 : vector<16x1xf32> to vector<1x16x1xf32>
    tpu.vector_store %arg5[%c0_10, %c0_11, %c0_12], %15 {strides = array<i32>} : memref<1x16x1xf32, #tpu.memory_space<vmem>>, vector<1x16x1xf32>,
    %c0_13 = arith.constant 0 : index
    %c0_14 = arith.constant 0 : index
    %c0_15 = arith.constant 0 : index
    %16 = vector.load %arg6[%c0_13, %c0_14, %c0_15] : memref<1x16x1xf32, #tpu.memory_space<vmem>>, vector<1x16x1xf32>
    %17 = vector.shape_cast %16 : vector<1x16x1xf32> to vector<16x1xf32>
    %18 = arith.mulf %5, %5 : vector<16x128xf32>
    %cst_16 = arith.constant dense<0.000000e+00> : vector<16xf32>
    %19 = vector.multi_reduction <add>, %18, %cst_16 [1] : vector<16x128xf32> to vector<16xf32>
    %20 = vector.shape_cast %19 : vector<16xf32> to vector<16x1xf32>
    %21 = arith.addf %17, %20 : vector<16x1xf32>
    %c0_17 = arith.constant 0 : index
    %c0_18 = arith.constant 0 : index
    %c0_19 = arith.constant 0 : index
    %22 = vector.load %arg6[%c0_17, %c0_18, %c0_19] : memref<1x16x1xf32, #tpu.memory_space<vmem>>, vector<1x16x1xf32>
    %23 = vector.shape_cast %22 : vector<1x16x1xf32> to vector<16x1xf32>
    %24 = vector.shape_cast %21 : vector<16x1xf32> to vector<1x16x1xf32>
    tpu.vector_store %arg6[%c0_17, %c0_18, %c0_19], %24 {strides = array<i32>} : memref<1x16x1xf32, #tpu.memory_space<vmem>>, vector<1x16x1xf32>,
    return
  }
  func.func @transform_0(%arg0: i32, %arg1: i32) -> (i32, i32) {
    %c0_i32 = arith.constant 0 : i32
    %c0_i32_0 = arith.constant 0 : i32
    %c0_i32_1 = arith.constant 0 : i32
    return %c0_i32, %c0_i32_0 : i32, i32
  }
  func.func @transform_1(%arg0: i32, %arg1: i32) -> (i32, i32) {
    %c1_i32 = arith.constant 1 : i32
    %0 = arith.muli %arg0, %c1_i32 : i32
    %1 = arith.addi %0, %arg1 : i32
    %c0_i32 = arith.constant 0 : i32
    %c0_i32_0 = arith.constant 0 : i32
    return %c0_i32, %1 : i32, i32
  }
  func.func @transform_2(%arg0: i32, %arg1: i32) -> (i32, i32) {
    %c1_i32 = arith.constant 1 : i32
    %0 = arith.muli %arg0, %c1_i32 : i32
    %1 = arith.addi %0, %arg1 : i32
    %c0_i32 = arith.constant 0 : i32
    %c0_i32_0 = arith.constant 0 : i32
    return %c0_i32, %1 : i32, i32
  }
  func.func @transform_3(%arg0: i32, %arg1: i32) -> (i32, i32, i32) {
    %c0_i32 = arith.constant 0 : i32
    %c0_i32_0 = arith.constant 0 : i32
    %c0_i32_1 = arith.constant 0 : i32
    return %arg0, %c0_i32, %c0_i32_0 : i32, i32, i32
  }
  func.func @transform_4(%arg0: i32, %arg1: i32) -> (i32, i32, i32) {
    %c0_i32 = arith.constant 0 : i32
    %c0_i32_0 = arith.constant 0 : i32
    %c0_i32_1 = arith.constant 0 : i32
    return %arg0, %c0_i32, %c0_i32_0 : i32, i32, i32
  }
}

</mosaic_0001>

<bundles_post_ra>
// kernel: downsampling_layer.1
= control target key start
LH: loop header
LB: loop body
LE: loop exit
PB: predicated region body
PF: predicated region fallthrough
CT: control target
= control target key end

     0   :  { %s758_s15 = smov 0   ;;  %s760_s16 = smov 0   ;;  %s857_s0 = inlined_call_operand.vmem [shape: bf16[16,36], index: 0, kind: input, shape index: {}]   ;;  %s858_s1 = inlined_call_operand.vmem [shape: bf16[36,256], index: 1, kind: input, shape index: {}]   ;;  %s859_s2 = inlined_call_operand.vmem [shape: bf16[16,256], index: 2, kind: output, shape index: {0}]   ;;  %s860_s3 = inlined_call_operand.vmem [shape: f32[2,16,1], index: 3, kind: output, shape index: {1}]   ;;  %s861_s4 = inlined_call_operand.vmem [shape: f32[2,16,1], index: 4, kind: output, shape index: {2}]  }
   0x1   :  { %s762_s17 = smov 0   ;;  %s764_s18 = smov 0  }
   0x2   :  { %s766_s19 = smov 0  }
   0x3 LB: > { %s27_s20 = sadd.s32 1, %s725_s18  ;;  %s598_s21 = sadd.s32 4294967295, %s729_s19   ;;  %s729_s19 = sphi %s766_s19, %s15_s19   ;;  %s725_s18 = sphi %s764_s18, %s866_s18   ;;  %s721_s17 = sphi %s762_s17, %s865_s17   ;;  %s717_s16 = sphi %s760_s16, %s864_s16   ;;  %s713_s15 = sphi %s758_s15, %s863_s15  }
   0x4   : > { %p29_p0 = scmp.ge.s32.totalorder %s27_s20, 2  ;;  %p64_p1 = scmp.ne.s32.totalorder %s717_s16, %s713_s15 }
   0x5   : > { %p65_p2 = scmp.eq.s32.totalorder %s729_s19, 0  ;;  %p96_p4 = scmp.eq.s32.totalorder %s598_s21, 1 }
   0x6   : > { %s868_s20 = smov (%p29_p0, %s27_s20), 0  ;;  %s57_s23 = sadd.s32 1, %s717_s16 }
   0x7   : > { %p66_p3 = por %p65_p2, %p64_p1  ;;  %s54_s22 = ssub.s32 %s725_s18, %s868_s20 }
   0x8   : > { %p55_p5 = scmp.eq.s32.totalorder %s54_s22, 0  ;;  %p793_p6 = por %p96_p4, %p64_p1 }
   0x9   : > { %p601_p7 = scmp.ge.s32.totalorder %s729_s19, 2 }
   0xa   : > { %s798_s25 = scalar_select %p55_p5, %s717_s16, %s57_s23  }
   0xb   : > { %173 = sbr.rel (%p601_p7) target bundleno = 26 (0x1a), region = 20 }
  0x12   : > { %176 = sbr.rel (!%p66_p3) target bundleno = 26 (0x1a), region = 24  ;;  %s178_s26 = sand.u32 (%p66_p3), 1, %s717_s16  }
  0x13   : > { %s602_s27 = sshll.u32 (%p66_p3), %s725_s18, 2  ;;  %s643_s28 = smul.u32 (%p66_p3), 20, %s178_s26 }
  0x14   : > { %s183_s5 = scalar_lea.vmem (%p66_p3), %s858_s1, %s602_s27 }
  0x15   : > { %v199_v0 = vld [vmem:[%s183_s5] sm:$0xf] (%p66_p3)  ;;  %v201_v1 = vld [vmem:[%s183_s5 + $0x8] sm:$0xf] (%p66_p3)  ;;  %v203_v2 = vld [vmem:[%s183_s5 + $0x10] sm:$0xf] (%p66_p3) }
  0x16   : > { %v205_v3 = vld [vmem:[%s183_s5 + $0x18] sm:$0xf] (%p66_p3)  ;;  %v207_v4 = vld [vmem:[%s183_s5 + $0x20] sm:$0xf] (%p66_p3)  ;;  %s180_s6 = scalar_lea.vmem (%p66_p3), [#allocation2], %s643_s28 }
  0x17   : > { %200 = vst [vmem:[%s180_s6] sm:$0xf] (%p66_p3), %v199_v0  ;;  %202 = vst [vmem:[%s180_s6 + $0x4] sm:$0xf] (%p66_p3), %v201_v1 }
  0x18   : > { %204 = vst [vmem:[%s180_s6 + $0x8] sm:$0xf] (%p66_p3), %v203_v2  ;;  %206 = vst [vmem:[%s180_s6 + $0xc] sm:$0xf] (%p66_p3), %v205_v3 }
  0x19   : > { %208 = vst [vmem:[%s180_s6 + $0x10] sm:$0xf] %v207_v4 }
  0x1a PF: > { %p603_p8 = scmp.ge.s32.totalorder %s729_s19, 1  ;;  %p240_p9 = scmp.lt.s32.totalorder %s729_s19, 3 }
  0x1c   : > { %p241_p10 = pnand %p603_p8, %p240_p9 }
  0x1d   : > { %s247_s7 = sand.u32 (!%p241_p10), 1, %s713_s15   ;;  %v731_v5 = vmov (!%p241_p10), 0.0   ;;  %vm732_vm0 = vmmov (!%p241_p10), 0   ;;  %vm334_vm1 = vcmask (!%p241_p10), 1041408   ;;  %v690_v10 = vld [vmem:[%s857_s0] sm:$0xff] (!%p241_p10)   ;;  %vm330_vm2 = vcmask (!%p241_p10), 293888  }
  0x1e   : > { %244 = sbr.rel (%p241_p10) target bundleno = 409 (0x199), region = 65  ;;  %633 = vmatprep.subr.bf16.mxu0 (!%p241_p10), %v731_v5  ;;  %639 = vmatprep.mubr.msk.bf16.mxu0 (!%p241_p10), %vm732_vm0, %v731_v5  ;;  %p283_p11 = scmp.lt.s32.totalorder (!%p241_p10), %s721_s17, 1  ;;  %vm298_vm3 = vcmask (!%p241_p10), 7168  }
  0x1f   : > { %s644_s8 = smul.u32 (!%p241_p10), 20, %s247_s7  ;;  %s604_s22 = sshll.u32 (!%p241_p10), %s247_s7, 3 }
  0x20   : > { %s266_s23 = scalar_lea.vmem (!%p241_p10), [#allocation3], %s604_s22 }
  0x21   : > { %s249_s9 = scalar_lea.vmem (!%p241_p10), [#allocation2], %s644_s8 }
  0x22   : > { %v687_v6 = vld [vmem:[%s249_s9] sm:$0xff] (!%p241_p10)   ;;  %v688_v7 = vld [vmem:[%s249_s9 + $0x8] sm:$0xff] (!%p241_p10)   ;;  %v689_v8 = vld [vmem:[%s249_s9 + $0x10] ss:$0 sps:$4 sm:$0x33] (!%p241_p10)  }
  0x23   : > { %634 = vmatpush3.bf16.msra.mxu0 (!%p241_p10), %v687_v6  ;;  %v336_v9 = vsel (!%p241_p10), %vm334_vm1, %v689_v8, 0 }
  0x24   : > { %635 = vmatprep.subr.bf16.mxu0 (!%p241_p10), %v731_v5 }
  0x25   : > { %s284_s12 = scalar_select %p283_p11, %s721_s17, 1 }
  0x26   : > { %s617_s29 = sshll.u32 (%p793_p6), %s721_s17, 2 }
  0x27   : > { %636 = vmatpush3.bf16.msra.mxu0 %v688_v7  ;;  %s620_s13 = sshll.u32 %s284_s12, 4  ;;  %s431_s6 = scalar_lea.vmem (%p793_p6), %s859_s2, %s617_s29 }
  0x28   : > { %637 = vmatprep.subr.bf16.mxu0 %v731_v5  ;;  %s817_s21 = scalar_lea.vmem %s860_s3, %s620_s13  ;;  %s292_s28 = scalar_lea.vmem %s861_s4, %s620_s13 }
  0x29   : > { %299 = vst.msk [vmem:[%s817_s21] sm:$0xff] %vm298_vm3, %v731_v5  ;;  %300 = vst.msk [vmem:[%s817_s21 + $0x8] sm:$0xff] %vm298_vm3, %v731_v5 }
  0x2a   : > { %301 = vst.msk [vmem:[%s292_s28] sm:$0xff] %vm298_vm3, %v731_v5  ;;  %302 = vst.msk [vmem:[%s292_s28 + $0x8] sm:$0xff] %vm298_vm3, %v731_v5 }
  0x2b   : > { %638 = vmatpush3.bf16.msra.mxu0 %v336_v9 }
  0x2e   : > { %640 = vmatmul.mubr.msk.bf16.vlgmr.msra.gmra.mrb[0].mxu0 %vm330_vm2, %v690_v10 }
  0x30   : > { %v389_v18 = vld [vmem:[%s817_s21] sm:$0xff]  ;;  %v390_v23 = vld [vmem:[%s817_s21 + $0x8] sm:$0xff] }
  0x31   : > { %v400_v20 = vld [vmem:[%s292_s28] sm:$0xff]  ;;  %v401_v26 = vld [vmem:[%s292_s28 + $0x8] sm:$0xff] }
 0x101   : > { %v372_v11 = vpop.f32.mrb[0].mxu0 }
 0x102   : > { %391 = vadd.xlane.f32.xlu0 %v372_v11  ;;  %v641_v12 = vpop.f32.mrb[1].mxu0  ;;  %v402_v13 = vmul.f32 %v372_v11, %v372_v11 }
 0x103   : > { %v375_v14 = vpop.f32.mrb[2].mxu0 }
 0x104   : > { %v627_v15 = vpack.c.bf16 %v375_v14, %v372_v11  ;;  %404 = vadd.xlane.f32.xlu1 %v402_v13  ;;  %v642_v16 = vpop.f32.mrb[3].mxu0  ;;  %v403_v17 = vmul.f32 %v375_v14, %v375_v14 }
 0x106   : > { %628 = vst [vmem:[%s266_s23] sm:$0xff] %v627_v15   ;;  %393 = vadd.xlane.f32.xlu0 %v375_v14 }
 0x108   : > { %406 = vadd.xlane.f32.xlu1 %v403_v17 }
 0x10d   : > { %v447_v30 = vld [vmem:[%s266_s23] sm:$0xf] (%p793_p6)  ;;  %v449_v31 = vld [vmem:[%s266_s23 + $0x4] sm:$0xf] (%p793_p6) }
 0x10e   : > { %448 = vst [vmem:[%s431_s6] sm:$0xf] (%p793_p6), %v447_v30  ;;  %450 = vst [vmem:[%s431_s6 + $0x8] sm:$0xf] (%p793_p6), %v449_v31 }
 0x18f   : > { %v392_v19 = vpop.xlane.xlu0 %391 }
 0x190   : > { %v395_v21 = vadd.f32 %v392_v19, %v389_v18 }
 0x191   : > { %v405_v22 = vpop.xlane.xlu1 %404 }
 0x192   : > { %398 = vst.msk [vmem:[%s817_s21] sm:$0xff] %vm298_vm3, %v395_v21  ;;  %v408_v24 = vadd.f32 %v405_v22, %v400_v20  ;;  %428 = sbr.rel (!%p793_p6) target bundleno = 409 (0x199), region = 77 }
 0x193   : > { %v394_v25 = vpop.xlane.xlu0 %393 }
 0x194   : > { %410 = vst.msk [vmem:[%s292_s28] sm:$0xff] %vm298_vm3, %v408_v24  ;;  %v396_v27 = vadd.f32 %v394_v25, %v390_v23 }
 0x195   : > { %v407_v28 = vpop.xlane.xlu1 %406 }
 0x196   : > { %399 = vst.msk [vmem:[%s817_s21 + $0x8] sm:$0xff] %vm298_vm3, %v396_v27  ;;  %v409_v29 = vadd.f32 %v407_v28, %v401_v26 }
 0x198   : > { %411 = vst.msk [vmem:[%s292_s28 + $0x8] sm:$0xff] %vm298_vm3, %v409_v29 }
 0x199 PF: > { %s15_s19 = sadd.s32 1, %s729_s19   ;;  %s863_s15 = smov %s717_s16 }
 0x19a   : > { %p12_p12 = scmp.ge.s32.totalorder %s15_s19, 4   ;;  %s864_s16 = smov %s798_s25 }
 0x19b   : > { %s865_s17 = smov %s725_s18  ;;  %s866_s18 = smov %s868_s20 }
 0x19c   :  { %14 = sbr.rel (!%p12_p12) target bundleno = 3 (0x3), region = 173 }

</bundles_post_ra>
